<compile_context>
chip_gen: v6e
topology: v6e:2x2x1
jax: 0.10.0
libtpu: 0.0.40
codegen_flags: <defaults>
</compile_context>

<pallas_src>
import jax
import jax.numpy as jnp
from jax import lax
from jax.experimental import pallas as pl
from jax.experimental.pallas import tpu as pltpu


def _local_inference_kernel(len1_ref, len2_ref,   # scalar-prefetch (SMEM) refs
                            x1_ref, x2_ref,       # inputs  (TB, L, H)  f32 VMEM
                            m1_ref, m2_ref):      # outputs (TB, L, 4H) f32 VMEM
    g = pl.program_id(0)
    TB, L1, H = x1_ref.shape
    L2 = x2_ref.shape[1]

    def body(t, carry):
        b = g * TB + t
        len1 = len1_ref[b]
        len2 = len2_ref[b]

        x1 = x1_ref[t]                      # (L1, H) f32
        x2 = x2_ref[t]                      # (L2, H) f32

        # e_ij = <x1_i, x2_j>  -> (L1, L2), contraction on H (no explicit transpose).
        e = lax.dot_general(x1, x2, (((1,), (1,)), ((), ())),
                            preferred_element_type=jnp.float32)

        # ---- softmax over L2 (mask positions >= len2) -> x1_tilde ----
        col2 = lax.broadcasted_iota(jnp.int32, (L1, L2), 1)
        e_m2 = jnp.where(col2 >= len2, -jnp.inf, e)
        p2 = jnp.exp(e_m2 - jnp.max(e_m2, axis=-1, keepdims=True))
        soft2 = p2 * pl.reciprocal(jnp.sum(p2, axis=-1, keepdims=True), approx=True)
        x1_tilde = jnp.dot(soft2, x2, preferred_element_type=jnp.float32)  # (L1, H)

        # ---- softmax over L1 (mask positions >= len1) -> x2_tilde ----
        e_t = e.T                                                          # (L2, L1)
        col1 = lax.broadcasted_iota(jnp.int32, (L2, L1), 1)
        e_m1 = jnp.where(col1 >= len1, -jnp.inf, e_t)
        p1 = jnp.exp(e_m1 - jnp.max(e_m1, axis=-1, keepdims=True))
        soft1 = p1 * pl.reciprocal(jnp.sum(p1, axis=-1, keepdims=True), approx=True)
        x2_tilde = jnp.dot(soft1, x1, preferred_element_type=jnp.float32)  # (L2, H)

        # ---- enhancement: single lane-dense (L, 4H) store per output ----
        m1_ref[t] = jnp.concatenate(
            [x1, x1_tilde, x1 - x1_tilde, x1 * x1_tilde], axis=-1
        ).astype(m1_ref.dtype)
        m2_ref[t] = jnp.concatenate(
            [x2, x2_tilde, x2 - x2_tilde, x2 * x2_tilde], axis=-1
        ).astype(m2_ref.dtype)
        return carry

    lax.fori_loop(0, TB, body, None, unroll=True)


def local_inference_modeling(x1_bar, seq_lengths1, x2_bar, seq_lengths2):
    """Pallas implementation of ESIM LocalInferenceModeling.forward."""
    B, L1, H = x1_bar.shape
    B2, L2, H2 = x2_bar.shape
    assert B2 == B and H2 == H

    x1_bar = x1_bar.astype(jnp.float32)
    x2_bar = x2_bar.astype(jnp.float32)
    seq_lengths1 = seq_lengths1.astype(jnp.int32)
    seq_lengths2 = seq_lengths2.astype(jnp.int32)

    # ---- batch-block size: amortize grid-step overhead, stay within VMEM ----
    per_batch_block_bytes = 4 * (L1 + L2) * H * 5      # f32: input (H) + output (4H)
    dbl_buffered = 2 * per_batch_block_bytes           # BlockSpec double-buffering
    vmem_budget = 24 * 1024 * 1024                     # conservative (v7x: 64 MiB phys)
    tb_cap = max(1, vmem_budget // dbl_buffered)
    TB = int(max(1, min(tb_cap, (B + 1) // 2)))        # keep grid >= 2 when B >= 2

    n_blocks = -(-B // TB)
    B_pad = n_blocks * TB
    if B_pad != B:
        pad = B_pad - B
        x1_bar = jnp.pad(x1_bar, ((0, pad), (0, 0), (0, 0)))
        x2_bar = jnp.pad(x2_bar, ((0, pad), (0, 0), (0, 0)))
        # Pad lengths with the full length so padded rows never hit the
        # all-masked (NaN) softmax path; their outputs are sliced off below.
        seq_lengths1 = jnp.pad(seq_lengths1, (0, pad), constant_values=L1)
        seq_lengths2 = jnp.pad(seq_lengths2, (0, pad), constant_values=L2)

    # Explicit VMEM limit from the actual block sizes (+ headroom for the
    # per-batch (L1, L2) softmax intermediates), clamped below v7x physical.
    inter_bytes = 8 * 4 * L1 * L2
    vmem_limit = int(min(60 * 1024 * 1024,
                         max(32 * 1024 * 1024,
                             2 * (TB * dbl_buffered + inter_bytes))))

    grid_spec = pltpu.PrefetchScalarGridSpec(
        num_scalar_prefetch=2,              # seq_lengths1, seq_lengths2 -> SMEM
        grid=(n_blocks,),
        in_specs=[
            pl.BlockSpec((TB, L1, H), lambda g, l1, l2: (g, 0, 0)),
            pl.BlockSpec((TB, L2, H), lambda g, l1, l2: (g, 0, 0)),
        ],
        out_specs=[
            pl.BlockSpec((TB, L1, 4 * H), lambda g, l1, l2: (g, 0, 0)),
            pl.BlockSpec((TB, L2, 4 * H), lambda g, l1, l2: (g, 0, 0)),
        ],
    )

    cost = pl.CostEstimate(
        flops=2 * 3 * B_pad * L1 * L2 * H,                 # three bmm passes
        transcendentals=2 * B_pad * L1 * L2,               # both softmax exps
        bytes_accessed=4 * B_pad * 5 * (L1 + L2) * H + 8 * B_pad,
    )

    m1, m2 = pl.pallas_call(
        _local_inference_kernel,
        out_shape=(
            jax.ShapeDtypeStruct((B_pad, L1, 4 * H), jnp.float32),
            jax.ShapeDtypeStruct((B_pad, L2, 4 * H), jnp.float32),
        ),
        grid_spec=grid_spec,
        compiler_params=pltpu.CompilerParams(
            dimension_semantics=("parallel",),
            vmem_limit_bytes=vmem_limit,
        ),
        cost_estimate=cost,
    )(seq_lengths1, seq_lengths2, x1_bar, x2_bar)

    if B_pad != B:
        m1 = m1[:B]
        m2 = m2[:B]
    return m1, m2


def _enh(x, xt):
    return jnp.concatenate([x, xt, x - xt, x * xt], axis=-1)


def _reference_f32(x1_bar, seq_lengths1, x2_bar, seq_lengths2):
    """Pure-f32 plain-JAX reference mirroring the PyTorch forward exactly."""
    e = jnp.einsum("bik,bjk->bij", x1_bar, x2_bar)
    _, L1, L2 = e.shape
    mask1 = jnp.arange(L1)[None, :] >= seq_lengths1[:, None]
    mask2 = jnp.arange(L2)[None, :] >= seq_lengths2[:, None]
    sm2 = jax.nn.softmax(jnp.where(mask2[:, None, :], -jnp.inf, e), axis=2)
    x1_tilde = jnp.einsum("bij,bjk->bik", sm2, x2_bar)
    e_t = jnp.swapaxes(e, 1, 2)
    sm1 = jax.nn.softmax(jnp.where(mask1[:, None, :], -jnp.inf, e_t), axis=2)
    x2_tilde = jnp.einsum("bji,bik->bjk", sm1, x1_bar)
    return _enh(x1_bar, x1_tilde), _enh(x2_bar, x2_tilde)


if __name__ == "__main__":
    B, L1, L2, H = 2, 8, 8, 32
    key = jax.random.PRNGKey(0)
    k1, k2 = jax.random.split(key)
    x1_bar = jax.random.normal(k1, (B, L1, H), dtype=jnp.float32)
    x2_bar = jax.random.normal(k2, (B, L2, H), dtype=jnp.float32)
    seq_lengths1 = jnp.array([8, 5], dtype=jnp.int32)
    seq_lengths2 = jnp.array([6, 8], dtype=jnp.int32)

    m1, m2 = local_inference_modeling(x1_bar, seq_lengths1, x2_bar, seq_lengths2)
    jax.block_until_ready((m1, m2))

    # Check vs the pure-f32 (PyTorch-equivalent) reference; the only deltas are
    # the approximate EUP reciprocal in the softmax and accumulation order.
    f1, f2 = _reference_f32(x1_bar, seq_lengths1, x2_bar, seq_lengths2)
    assert jnp.allclose(m1, f1, atol=2e-2, rtol=2e-2), "m1 mismatch"
    assert jnp.allclose(m2, f2, atol=2e-2, rtol=2e-2), "m2 mismatch"

    print("KERNEL_OK")
</pallas_src>

<mosaic_0001>
module attributes {stable_mosaic.version = 11 : i64} {
  func.func @_local_inference_kernel(%arg0: i32, %arg1: memref<2xi32, #tpu.memory_space<smem>>, %arg2: memref<2xi32, #tpu.memory_space<smem>>, %arg3: memref<1x8x32xf32, #tpu.memory_space<vmem>>, %arg4: memref<1x8x32xf32, #tpu.memory_space<vmem>>, %arg5: memref<1x8x128xf32, #tpu.memory_space<vmem>>, %arg6: memref<1x8x128xf32, #tpu.memory_space<vmem>>) attributes {dimension_semantics = [#tpu.dimension_semantics<parallel>], iteration_bounds = array<i64: 2>, scalar_prefetch = 2 : i64, scratch_operands = 0 : i64, tpu.core_type = #tpu.core_type<tc>, window_params = [{transform_indices = @transform_0, window_bounds = array<i64: 1, 8, 32>}, {transform_indices = @transform_1, window_bounds = array<i64: 1, 8, 32>}, {transform_indices = @transform_2, window_bounds = array<i64: 1, 8, 128>}, {transform_indices = @transform_3, window_bounds = array<i64: 1, 8, 128>}]} {
    %c0_i32 = arith.constant 0 : i32
    %c1_i32 = arith.constant 1 : i32
    %0 = arith.muli %arg0, %c1_i32 : i32
    %1 = arith.addi %0, %c0_i32 : i32
    %2 = arith.index_cast %1 : i32 to index
    %3 = memref.load %arg1[%2] : memref<2xi32, #tpu.memory_space<smem>>
    %4 = arith.index_cast %1 : i32 to index
    %5 = memref.load %arg2[%4] : memref<2xi32, #tpu.memory_space<smem>>
    %6 = arith.index_cast %c0_i32 : i32 to index
    %c0 = arith.constant 0 : index
    %c0_0 = arith.constant 0 : index
    %7 = vector.load %arg3[%6, %c0, %c0_0] : memref<1x8x32xf32, #tpu.memory_space<vmem>>, vector<1x8x32xf32>
    %8 = vector.shape_cast %7 : vector<1x8x32xf32> to vector<8x32xf32>
    %9 = arith.index_cast %c0_i32 : i32 to index
    %c0_1 = arith.constant 0 : index
    %c0_2 = arith.constant 0 : index
    %10 = vector.load %arg4[%9, %c0_1, %c0_2] : memref<1x8x32xf32, #tpu.memory_space<vmem>>, vector<1x8x32xf32>
    %11 = vector.shape_cast %10 : vector<1x8x32xf32> to vector<8x32xf32>
    %cst = arith.constant dense<0.000000e+00> : vector<8x8xf32>
    %12 = tpu.matmul %8, %11, %cst {dimension_numbers = #tpu.dot_dimension_numbers<[1], [1], [0], [0], [0, 0, 1, 0], [], []>} : vector<8x32xf32>, vector<8x32xf32>, vector<8x8xf32> -> vector<8x8xf32>
    %13 = tpu.iota {dimensions = array<i32: 1>} : vector<8x8xi32>
    %14 = vector.broadcast %5 : i32 to vector<8x8xi32>
    %15 = arith.cmpi sge, %13, %14 : vector<8x8xi32>
    %cst_3 = arith.constant 0xFF800000 : f32
    %16 = vector.broadcast %cst_3 : f32 to vector<8x8xf32>
    %17 = arith.select %15, %16, %12 : vector<8x8xi1>, vector<8x8xf32>
    %cst_4 = arith.constant dense<0xFF800000> : vector<8xf32>
    %18 = vector.multi_reduction <maximumf>, %17, %cst_4 [1] : vector<8x8xf32> to vector<8xf32>
    %19 = vector.shape_cast %18 : vector<8xf32> to vector<8x1xf32>
    %20 = vector.broadcast %19 : vector<8x1xf32> to vector<8x8xf32>
    %21 = arith.subf %17, %20 : vector<8x8xf32>
    %22 = math.exp %21 : vector<8x8xf32>
    %cst_5 = arith.constant dense<0.000000e+00> : vector<8xf32>
    %23 = vector.multi_reduction <add>, %22, %cst_5 [1] : vector<8x8xf32> to vector<8xf32>
    %24 = vector.shape_cast %23 : vector<8xf32> to vector<8x1xf32>
    %25 = tpu.reciprocal %24 {approx = true} : vector<8x1xf32> -> vector<8x1xf32>
    %26 = vector.broadcast %25 : vector<8x1xf32> to vector<8x8xf32>
    %27 = arith.mulf %22, %26 : vector<8x8xf32>
    %cst_6 = arith.constant dense<0.000000e+00> : vector<8x32xf32>
    %28 = tpu.matmul %27, %11, %cst_6 {dimension_numbers = #tpu.dot_dimension_numbers<[1], [0], [0], [1], [0, 0, 1, 1], [], []>} : vector<8x8xf32>, vector<8x32xf32>, vector<8x32xf32> -> vector<8x32xf32>
    %29 = tpu.transpose %12, [1, 0] : vector<8x8xf32> -> vector<8x8xf32>
    %30 = tpu.iota {dimensions = array<i32: 1>} : vector<8x8xi32>
    %31 = vector.broadcast %3 : i32 to vector<8x8xi32>
    %32 = arith.cmpi sge, %30, %31 : vector<8x8xi32>
    %cst_7 = arith.constant 0xFF800000 : f32
    %33 = vector.broadcast %cst_7 : f32 to vector<8x8xf32>
    %34 = arith.select %32, %33, %29 : vector<8x8xi1>, vector<8x8xf32>
    %cst_8 = arith.constant dense<0xFF800000> : vector<8xf32>
    %35 = vector.multi_reduction <maximumf>, %34, %cst_8 [1] : vector<8x8xf32> to vector<8xf32>
    %36 = vector.shape_cast %35 : vector<8xf32> to vector<8x1xf32>
    %37 = vector.broadcast %36 : vector<8x1xf32> to vector<8x8xf32>
    %38 = arith.subf %34, %37 : vector<8x8xf32>
    %39 = math.exp %38 : vector<8x8xf32>
    %cst_9 = arith.constant dense<0.000000e+00> : vector<8xf32>
    %40 = vector.multi_reduction <add>, %39, %cst_9 [1] : vector<8x8xf32> to vector<8xf32>
    %41 = vector.shape_cast %40 : vector<8xf32> to vector<8x1xf32>
    %42 = tpu.reciprocal %41 {approx = true} : vector<8x1xf32> -> vector<8x1xf32>
    %43 = vector.broadcast %42 : vector<8x1xf32> to vector<8x8xf32>
    %44 = arith.mulf %39, %43 : vector<8x8xf32>
    %cst_10 = arith.constant dense<0.000000e+00> : vector<8x32xf32>
    %45 = tpu.matmul %44, %8, %cst_10 {dimension_numbers = #tpu.dot_dimension_numbers<[1], [0], [0], [1], [0, 0, 1, 1], [], []>} : vector<8x8xf32>, vector<8x32xf32>, vector<8x32xf32> -> vector<8x32xf32>
    %46 = arith.subf %8, %28 : vector<8x32xf32>
    %47 = arith.mulf %8, %28 : vector<8x32xf32>
    %48 = tpu.concatenate %8, %28, %46, %47 in 1 : vector<8x32xf32>, vector<8x32xf32>, vector<8x32xf32>, vector<8x32xf32> -> vector<8x128xf32>
    %49 = arith.index_cast %c0_i32 : i32 to index
    %c0_11 = arith.constant 0 : index
    %c0_12 = arith.constant 0 : index
    %50 = vector.load %arg5[%49, %c0_11, %c0_12] : memref<1x8x128xf32, #tpu.memory_space<vmem>>, vector<1x8x128xf32>
    %51 = vector.shape_cast %50 : vector<1x8x128xf32> to vector<8x128xf32>
    %52 = vector.shape_cast %48 : vector<8x128xf32> to vector<1x8x128xf32>
    tpu.vector_store %arg5[%49, %c0_11, %c0_12], %52 {strides = array<i32>} : memref<1x8x128xf32, #tpu.memory_space<vmem>>, vector<1x8x128xf32>,
    %53 = arith.subf %11, %45 : vector<8x32xf32>
    %54 = arith.mulf %11, %45 : vector<8x32xf32>
    %55 = tpu.concatenate %11, %45, %53, %54 in 1 : vector<8x32xf32>, vector<8x32xf32>, vector<8x32xf32>, vector<8x32xf32> -> vector<8x128xf32>
    %56 = arith.index_cast %c0_i32 : i32 to index
    %c0_13 = arith.constant 0 : index
    %c0_14 = arith.constant 0 : index
    %57 = vector.load %arg6[%56, %c0_13, %c0_14] : memref<1x8x128xf32, #tpu.memory_space<vmem>>, vector<1x8x128xf32>
    %58 = vector.shape_cast %57 : vector<1x8x128xf32> to vector<8x128xf32>
    %59 = vector.shape_cast %55 : vector<8x128xf32> to vector<1x8x128xf32>
    tpu.vector_store %arg6[%56, %c0_13, %c0_14], %59 {strides = array<i32>} : memref<1x8x128xf32, #tpu.memory_space<vmem>>, vector<1x8x128xf32>,
    %c1_i32_15 = arith.constant 1 : i32
    return
  }
  func.func @transform_0(%arg0: i32, %arg1: memref<2xi32, #tpu.memory_space<smem>>, %arg2: memref<2xi32, #tpu.memory_space<smem>>) -> (i32, i32, i32) {
    %c0_i32 = arith.constant 0 : i32
    %c0_i32_0 = arith.constant 0 : i32
    %c0_i32_1 = arith.constant 0 : i32
    return %arg0, %c0_i32, %c0_i32_0 : i32, i32, i32
  }
  func.func @transform_1(%arg0: i32, %arg1: memref<2xi32, #tpu.memory_space<smem>>, %arg2: memref<2xi32, #tpu.memory_space<smem>>) -> (i32, i32, i32) {
    %c0_i32 = arith.constant 0 : i32
    %c0_i32_0 = arith.constant 0 : i32
    %c0_i32_1 = arith.constant 0 : i32
    return %arg0, %c0_i32, %c0_i32_0 : i32, i32, i32
  }
  func.func @transform_2(%arg0: i32, %arg1: memref<2xi32, #tpu.memory_space<smem>>, %arg2: memref<2xi32, #tpu.memory_space<smem>>) -> (i32, i32, i32) {
    %c0_i32 = arith.constant 0 : i32
    %c0_i32_0 = arith.constant 0 : i32
    %c0_i32_1 = arith.constant 0 : i32
    return %arg0, %c0_i32, %c0_i32_0 : i32, i32, i32
  }
  func.func @transform_3(%arg0: i32, %arg1: memref<2xi32, #tpu.memory_space<smem>>, %arg2: memref<2xi32, #tpu.memory_space<smem>>) -> (i32, i32, i32) {
    %c0_i32 = arith.constant 0 : i32
    %c0_i32_0 = arith.constant 0 : i32
    %c0_i32_1 = arith.constant 0 : i32
    return %arg0, %c0_i32, %c0_i32_0 : i32, i32, i32
  }
}

</mosaic_0001>

<bundles_post_ra>
// kernel: tpu_custom_call.1
= control target key start
LH: loop header
LB: loop body
LE: loop exit
PB: predicated region body
PF: predicated region fallthrough
CT: control target
= control target key end

     0   :  { %s1021_s18 = smov [#allocation3]   ;;  %s1333_s0 = inlined_call_operand.hbm [shape: s32[2], index: 0, kind: input, shape index: {}]   ;;  %s1334_s2 = inlined_call_operand.hbm [shape: f32[2,8,32], index: 2, kind: input, shape index: {}]   ;;  %s1335_s3 = inlined_call_operand.hbm [shape: f32[2,8,32], index: 3, kind: input, shape index: {}]   ;;  %s1336_s4 = inlined_call_operand.hbm [shape: f32[2,8,128], index: 4, kind: output, shape index: {0}]   ;;  %s1337_s5 = inlined_call_operand.hbm [shape: f32[2,8,128], index: 5, kind: output, shape index: {1}]   ;;  %s1338_s1 = inlined_call_operand.vmem [shape: s32[2], index: 1, kind: input, shape index: {}]  }
   0x1   :  { %12 = dma.hbm_to_smem %s1333_s0, 16, %s1021_s18, [#allocation2] }
   0x2   :  { %s13_s23 = sshll.u32 %s1338_s1, 4  ;;  %s14_s23 = int_to_ptr.vmem [resolvable:$true] %s13_s23 }
   0x3   :  { %s851_s24 = scalar_lea.vmem %s14_s23, 16  ;;  %p856_p1 = scmp.lt.s32.totalorder %s14_s23, %s14_s23 }
   0x4   :  { %p852_p0 = scmp.ne.s32.totalorder %s14_s23, %s851_s24  ;;  %p857_p2 = scmp.lt.s32.totalorder %s851_s24, %s851_s24 }
   0x6   :  { %p858_p3 = por %p857_p2, %p856_p1 }
   0x8   :  { %p859_p4 = pnand %p858_p3, %p852_p0 }
   0xa   :  { %862 = shalt.err (!%p859_p4)  }
   0xb   :  { %s1022_s25 = smov [#allocation4]  }
   0xc   :  { %16 = dma.vmem_to_smem %s14_s23, 16, %s1022_s25, [#allocation2] }
   0xd   :  { %987 = dma.done.wait [#allocation2], 32 }
   0xe   :  { %988 = vsyncadd [#allocation2], 4294967264 }
   0xf   :  { %18 = sfence }
  0x10   :  { %19 = vsyncpa [#allocation6], 0 }
  0x11   :  { %21 = vsyncpa [#allocation6 + $0x1], 0 }
  0x12   :  { %22 = vsyncpa [#allocation9], 0 }
  0x13   :  { %24 = vsyncpa [#allocation9 + $0x1], 0 }
  0x14   :  { %25 = vsyncpa [#allocation7], 0 }
  0x15   :  { %27 = vsyncpa [#allocation7 + $0x1], 0 }
  0x16   :  { %28 = vsyncpa [#allocation12], 0 }
  0x17   :  { %30 = vsyncpa [#allocation12 + $0x1], 0  ;;  %s1068_s0 = smov 0   ;;  %s1070_s1 = smov 0  }
  0x18   :  { %s1072_s26 = smov 0   ;;  %s1074_s27 = smov 0  }
  0x19 LB: > { %s1089_s28 = sadd.s32 4294967295, %s1019_s27   ;;  %s729_s29 = sadd.s32 4294967294, %s1019_s27   ;;  %s1019_s27 = sphi %s1074_s27, %s1357_s27   ;;  %s1015_s26 = sphi %s1072_s26, %s1356_s26   ;;  %s1011_s1 = sphi %s1070_s1, %s1355_s1   ;;  %s1007_s0 = sphi %s1068_s0, %s1354_s0  }
  0x1a   : > { %s1093_s30 = sadd.s32 1, %s1019_s27   ;;  %s43_s6 = sadd.s32 1, %s1015_s26 }
  0x1b   : > { %s40_s7 = ssub.s32 %s1019_s27, %s1093_s30  ;;  %p50_p5 = scmp.ne.s32.totalorder %s1015_s26, %s1011_s1 }
  0x1c   : > { %p41_p6 = scmp.eq.s32.totalorder %s40_s7, 0  ;;  %p51_p7 = scmp.eq.s32.totalorder %s1019_s27, 0 }
  0x1d   : > { %p56_p8 = scmp.ne.s32.totalorder %s1011_s1, %s1007_s0  ;;  %p57_p9 = scmp.eq.s32.totalorder %s1089_s28, 0 }
  0x1e   : > { %s1105_s8 = scalar_select %p41_p6, %s1015_s26, %s43_s6  }
  0x1f   : > { %p1107_p10 = por %p51_p7, %p50_p5  ;;  %p1111_p11 = por %p57_p9, %p56_p8 }
  0x20   : > { %p106_p12 = scmp.eq.s32.totalorder %s1089_s28, 1  ;;  %p112_p13 = scmp.eq.s32.totalorder %s729_s29, 1 }
  0x21   : > { %s1342_s10 = scalar_select %p1111_p11, 1, 0 }
  0x22   : > { %p794_p1 = scmp.lt.s32.totalorder %s1019_s27, 2  ;;  %p1118_p2 = por %p106_p12, %p50_p5 }
  0x23   : > { %p1122_p3 = por %p112_p13, %p56_p8  ;;  %s1127_s13 = sand.u32 1, %s1015_s26  }
  0x24   : > { %s1343_s11 = scalar_select %p1118_p2, 1, 0 }
  0x25   : > { %s1344_s12 = scalar_select %p1122_p3, 1, 0 }
  0x26   : > { %s733_s14 = sshll.u32 %s1019_s27, 7  ;;  %s732_s15 = sshll.u32 %s1127_s13, 3 }
  0x27   : > { %s1136_s18 = scalar_lea.hbm %s1334_s2, %s733_s14  ;;  %s162_s19 = scalar_lea.vmem [#allocation5], %s732_s15 }
  0x28   : > { %s169_s20 = sshll.u32 %s162_s19, 4  ;;  %p1142_p4 = pnand %p794_p1, %p1107_p10  ;;  %s1146_s20 = int_to_ptr.vmem [resolvable:$true] %s169_s20 }
  0x29   : > { %s159_s22 = scalar_lea.sflag [#allocation6], %s1127_s13  ;;  %s863_s23 = scalar_lea.hbm %s1136_s18, 128 }
  0x2a   : > { %p864_p7 = scmp.ne.s32.totalorder %s1136_s18, %s863_s23  ;;  %p865_p8 = pneg %p1142_p4 }
  0x2b   : > { %s868_s29 = scalar_lea.hbm %s1334_s2, 256  ;;  %p869_p10 = scmp.lt.s32.totalorder %s1136_s18, %s1334_s2 }
  0x2c   : > { %p866_p9 = pnand %p865_p8, %p864_p7  ;;  %p870_p13 = scmp.lt.s32.totalorder %s868_s29, %s863_s23 }
  0x2e   : > { %p867_p12 = pneg %p866_p9  ;;  %p871_p1 = por %p870_p13, %p869_p10 }
  0x30   : > { %p872_p0 = pnand %p871_p1, %p867_p12 }
  0x32   : > { %875 = shalt.err (!%p872_p0)
}
  0x33   : > { %s876_s9 = scalar_lea.vmem %s1146_s20, 128  ;;  %s1023_s16 = smov [#allocation5]  }
  0x34   : > { %p877_p5 = scmp.ne.s32.totalorder %s1146_s20, %s876_s9  ;;  %s881_s17 = sshll.u32 %s1023_s16, 4  ;;  %s882_s17 = int_to_ptr.vmem [resolvable:$false] %s881_s17 }
  0x35   : > { %s883_s19 = scalar_lea.vmem %s882_s17, 256  ;;  %p884_p6 = scmp.lt.s32.totalorder %s1146_s20, %s882_s17 }
  0x36   : > { %p879_p7 = pnand %p877_p5, %p865_p8  ;;  %p885_p3 = scmp.lt.s32.totalorder %s883_s19, %s876_s9 }
  0x38   : > { %p880_p9 = pneg %p879_p7  ;;  %p886_p2 = por %p885_p3, %p884_p6 }
  0x3a   : > { %p887_p10 = pnand %p886_p2, %p880_p9 }
  0x3c   : > { %890 = shalt.err (!%p887_p10)
}
  0x3d   : > { %783 = dma.hbm_to_vmem [thread:$0]  (!%p1142_p4), %s1136_s18, 128, %s1146_s20, %s159_s22  }
  0x3e   : > { %p1346_p0 = scmp.lt.s32.totalorder %s1019_s27, 3  ;;  %p1347_p5 = scmp.ge.s32.totalorder %s1019_s27, 1 }
  0x3f   : > { %s1188_s29 = scalar_lea.hbm %s1335_s3, %s733_s14  ;;  %s180_s6 = scalar_lea.vmem [#allocation8], %s732_s15 }
  0x40   : > { %p1179_p12 = pnand %p1347_p5, %p1346_p0  ;;  %s187_s7 = sshll.u32 %s180_s6, 4  ;;  %s188_s7 = int_to_ptr.vmem [resolvable:$true] %s187_s7 }
  0x41   : > { %s177_s18 = scalar_lea.sflag [#allocation9], %s1127_s13  ;;  %s891_s20 = scalar_lea.hbm %s1188_s29, 128 }
  0x42   : > { %s1348_s23 = scalar_select %p1179_p12, 1, 0 }
  0x43   : > { %p892_p2 = scmp.ne.s32.totalorder %s1188_s29, %s891_s20  ;;  %s896_s16 = scalar_lea.hbm %s1335_s3, 256 }
  0x44   : > { %p897_p13 = scmp.lt.s32.totalorder %s1188_s29, %s1335_s3  ;;  %p898_p1 = scmp.lt.s32.totalorder %s896_s16, %s891_s20 }
  0x45   : > { %p894_p3 = pnand %p892_p2, %p865_p8 }
  0x46   : > { %p899_p7 = por %p898_p1, %p897_p13 }
  0x47   : > { %p895_p6 = pneg %p894_p3 }
  0x49   : > { %p900_p9 = pnand %p899_p7, %p895_p6 }
  0x4b   : > { %903 = shalt.err (!%p900_p9)
}
  0x4c   : > { %s904_s15 = scalar_lea.vmem %s188_s7, 128  ;;  %s1024_s13 = smov [#allocation8]  }
  0x4d   : > { %p905_p10 = scmp.ne.s32.totalorder %s188_s7, %s904_s15  ;;  %s909_s19 = sshll.u32 %s1024_s13, 4  ;;  %s910_s19 = int_to_ptr.vmem [resolvable:$false] %s909_s19 }
  0x4e   : > { %s911_s24 = scalar_lea.vmem %s910_s19, 256  ;;  %p912_p2 = scmp.lt.s32.totalorder %s188_s7, %s910_s19 }
  0x4f   : > { %p907_p0 = pnand %p905_p10, %p865_p8  ;;  %p913_p3 = scmp.lt.s32.totalorder %s911_s24, %s904_s15 }
  0x51   : > { %p908_p5 = pneg %p907_p0  ;;  %p914_p11 = por %p913_p3, %p912_p2 }
  0x53   : > { %p915_p12 = pnand %p914_p11, %p908_p5 }
  0x55   : > { %918 = shalt.err (!%p915_p12)
}
  0x56   : > { %786 = dma.hbm_to_vmem [thread:$0]  (!%p1142_p4), %s1188_s29, 128, %s188_s7, %s177_s18  }
  0x57   : > { %p1349_p6 = scmp.ne.s32.totalorder %s1348_s23, 0 }
  0x58   : > { %s1214_s25 = sand.u32 (!%p1349_p6), 1, %s1011_s1   ;;  %p1350_p11 = scmp.ne.s32.totalorder (!%p1349_p6), %s1342_s10, 0 }
  0x59   : > { %196 = sbr.rel (%p1349_p6) target bundleno = 1064 (0x428), region = 28  ;;  %s1217_s6 = sshll.u32 (!%p1349_p6), %s1214_s25, 3 }
  0x5a   : > { %s199_s20 = scalar_lea.sflag (!%p1349_p6), [#allocation6], %s1214_s25  ;;  %s202_s22 = scalar_lea.vmem (!%p1349_p6), [#allocation5], %s1217_s6 }
  0x5e   : > { %990 = dma.done.wait (%p1350_p11), %s199_s20, 128  }
  0x5f   : > { %992 = vsyncadd (%p1350_p11), %s199_s20, 4294967168  ;;  %s208_s21 = scalar_lea.sflag [#allocation9], %s1214_s25  ;;  %s211_s23 = scalar_lea.vmem [#allocation8], %s1217_s6 }
  0x60   : > { %994 = dma.done.wait (%p1350_p11), %s208_s21, 128  }
  0x61   : > { %996 = vsyncadd (%p1350_p11), %s208_s21, 4294967168  ;;  %v1025_v0 = vmov 0.0   ;;  %vm1026_vm0 = vmmov 0   ;;  %vm248_vm1 = vcmask 261120   ;;  %v1233_v1 = vld [vmem:[%s211_s23] sm:$0xff]  ;;  %v1237_v2 = vld [vmem:[%s202_s22] sm:$0xff]  ;;  %v325_v5 = vlaneseq }
  0x62   : > { %757 = vmatprep.subr.mxu0 %v1025_v0  ;;  %759 = vmatprep.mubr.msk.f32.mxu0 %vm1026_vm0, %v1025_v0  ;;  %s245_s10 = sld [smem:[#allocation4 + %s1089_s28]]  ;;  %vm330_vm3 = vcmask 64512   ;;  %s1027_s7 = smov 32   ;;  %vm549_vm5 = vcmask 523264   ;;  %vm551_vm6 = vcmask 785408  }
  0x63   : > { %762 = vmatprep.subr.mxu1 %v1025_v0  ;;  %764 = vmatprep.mubr.msk.f32.mxu1 %vm1026_vm0, %v1025_v0  ;;  %v326_v6 = vand.u32 127, %v325_v5  ;;  %s244_s29 = sld [smem:[#allocation3 + %s1089_s28]]  ;;  %s1028_s18 = smov 64  }
  0x64   : > { %758 = vmatpush3.xpose.msk.msra.mxu0 %vm248_vm1, %v1233_v1  ;;  %763 = vmatpush3.msra.mxu1 %v1233_v1  ;;  %s1029_s9 = smov 96   ;;  %s747_s16 = sshll.u32 %s1089_s28, 7 }
  0x65   : > { %767 = vmatprep.subr.mxu1 %v1025_v0  ;;  %s236_s14 = scalar_lea.vmem [#allocation10], %s1217_s6  ;;  %s1266_s19 = scalar_lea.hbm %s1336_s4, %s747_s16 }
  0x66   : > { %s591_s17 = sshll.u32 %s236_s14, 4  ;;  %s573_s24 = scalar_lea.sflag [#allocation7], %s1214_s25  ;;  %s592_s17 = int_to_ptr.vmem [resolvable:$true] %s591_s17 }
  0x67   : > { %760 = vmatmul.mubr.msk.f32.vlgmr.msra.gmra.mxu0 %vm248_vm1, %v1237_v2  ;;  %s919_s20 = scalar_lea.vmem %s592_s17, 128  ;;  %p1351_p8 = scmp.ne.s32.totalorder %s1343_s11, 0 }
  0x68   : > { %v327_v7 = vstv %s245_s10  ;;  %p920_p4 = scmp.ne.s32.totalorder %s592_s17, %s919_s20  ;;  %s1030_s22 = smov [#allocation10]  }
  0x69   : > { %vm328_vm2 = vcmp.ge.s32.totalorder %v326_v6, %v327_v7  ;;  %v447_v10 = vstv %s244_s29  ;;  %s923_s21 = sshll.u32 %s1030_s22, 4  ;;  %s924_s21 = int_to_ptr.vmem [resolvable:$false] %s923_s21 }
  0x6a   : > { %vm448_vm4 = vcmp.ge.s32.totalorder %v326_v6, %v447_v10  ;;  %p921_p12 = pnand %p920_p4, %p1351_p8  ;;  %s925_s23 = scalar_lea.vmem %s924_s21, 256 }
  0x6b   : > { %p926_p1 = scmp.lt.s32.totalorder %s592_s17, %s924_s21  ;;  %p927_p7 = scmp.lt.s32.totalorder %s925_s23, %s919_s20 }
  0x6c   : > { %p922_p13 = pneg %p921_p12 }
  0x6d   : > { %p928_p9 = por %p927_p7, %p926_p1 }
  0x6f   : > { %p929_p10 = pnand %p928_p9, %p922_p13 }
 0x127   : > { %v321_v3 = vpop.f32.mrf.mxu0 }
 0x128   : > { %415 = vxpose.xlu0.b32.start.end [1/1] (short) (narrow) %v321_v3, 8  ;;  %v329_v8 = vsel %vm328_vm2, -inf, %v321_v3 }
 0x129   : > { %v761_v4 = vpop.f32.mrf.mxu0  ;;  %v331_v9 = vsel %vm330_vm3, %v329_v8, -inf }
 0x155   : > { %332 = vmax.xlane.f32.xlu0 %v331_v9 }
 0x1a4   : > { %v431_v11 = vpop.trf.xlu0 }
 0x1a5   : > { %v449_v12 = vsel %vm448_vm4, -inf, %v431_v11 }
 0x1a6   : > { %v450_v13 = vsel %vm330_vm3, %v449_v12, -inf }
 0x1a7   : > { %451 = vmax.xlane.f32.xlu1 %v450_v13 }
 0x1de   : > { %v333_v14 = vpop.xlane.xlu0 %332 }
 0x1df   : > { %v334_v15 = vsub.f32 %v329_v8, %v333_v14 }
 0x1e1   : > { %v335_v16 = vmul.f32 1.442695, %v334_v15 }
 0x1e3   : > { %835 = vpow2.f32 %v335_v16 }
 0x1f0   : > { %v836_v17 = vpop.eup %835 }
 0x1f1   : > { %v337_v18 = vsel %vm330_vm3, %v836_v17, 0.0 }
 0x1f2   : > { %338 = vadd.xlane.f32.xlu1 %v337_v18 }
 0x230   : > { %v452_v19 = vpop.xlane.xlu1 %451 }
 0x231   : > { %v453_v20 = vsub.f32 %v449_v12, %v452_v19 }
 0x233   : > { %v454_v21 = vmul.f32 1.442695, %v453_v20 }
 0x235   : > { %837 = vpow2.f32 %v454_v21 }
 0x242   : > { %v838_v22 = vpop.eup %837 }
 0x243   : > { %v456_v23 = vsel %vm330_vm3, %v838_v22, 0.0 }
 0x244   : > { %457 = vadd.xlane.f32.xlu1 %v456_v23 }
 0x27b   : > { %v339_v24 = vpop.xlane.xlu1 %338 }
 0x27c   : > { %839 = vrcp.f32 %v339_v24 }
 0x289   : > { %v840_v25 = vpop.eup %839 }
 0x28a   : > { %v341_v26 = vmul.f32 %v840_v25, %v836_v17 }
 0x28c   : > { %765 = vmatmul.mubr.msk.f32.vlgmr.msra.gmra.mxu1 %vm330_vm3, %v341_v26 }
 0x28d   : > { %768 = vmatpush3.msra.mxu1 %v1237_v2  ;;  %769 = vmatprep.mubr.msk.f32.mxu1 %vm1026_vm0, %v1025_v0 }
 0x2cd   : > { %v458_v27 = vpop.xlane.xlu1 %457 }
 0x2ce   : > { %841 = vrcp.f32 %v458_v27 }
 0x2db   : > { %v842_v28 = vpop.eup %841 }
 0x2dc   : > { %v460_v29 = vmul.f32 %v842_v28, %v838_v22 }
 0x2de   : > { %770 = vmatmul.mubr.msk.f32.vlgmr.msra.gmra.mxu1 %vm330_vm3, %v460_v29 }
 0x34c   : > { %v411_v30 = vpop.f32.mrf.mxu1 }
 0x34d   : > { %537 = vrot.lane.b32.xlu1 %v411_v30, %s1027_s7  ;;  %v534_v32 = vsub.f32 %v1237_v2, %v411_v30  ;;  %v535_v33 = vmul.f32 %v411_v30, %v1237_v2 }
 0x34e   : > { %v766_v31 = vpop.f32.mrf.mxu1 }
 0x351   : > { %541 = vrot.lane.b32.xlu1 %v534_v32, %s1028_s18 }
 0x355   : > { %545 = vrot.lane.b32.xlu1 %v535_v33, %s1029_s9 }
 0x39e   : > { %v530_v34 = vpop.f32.mrf.mxu1 }
 0x39f   : > { %557 = vrot.lane.b32.xlu1 %v530_v34, %s1027_s7  ;;  %v554_v36 = vsub.f32 %v1233_v1, %v530_v34  ;;  %v555_v37 = vmul.f32 %v530_v34, %v1233_v1 }
 0x3a0   : > { %v771_v35 = vpop.f32.mrf.mxu1 }
 0x3a3   : > { %561 = vrot.lane.b32.xlu1 %v554_v36, %s1028_s18 }
 0x3a7   : > { %565 = vrot.lane.b32.xlu1 %v555_v37, %s1029_s9 }
 0x3bf   : > { %v538_v38 = vpop.permute.xlu1 %537 }
 0x3c0   : > { %v548_v40 = vsel %vm248_vm1, %v1237_v2, %v538_v38 }
 0x3c3   : > { %v542_v39 = vpop.permute.xlu1 %541 }
 0x3c4   : > { %v550_v41 = vsel %vm549_vm5, %v548_v40, %v542_v39 }
 0x3c7   : > { %v546_v42 = vpop.permute.xlu1 %545 }
 0x3c8   : > { %v552_v43 = vsel %vm551_vm6, %v550_v41, %v546_v42 }
 0x3c9   : > { %553 = vst [vmem:[%s236_s14] sm:$0xff] %v552_v43 }
 0x3ca   : > { %932 = shalt.err (!%p929_p10)
}
 0x3cb   : > { %s933_s10 = scalar_lea.hbm %s1266_s19, 128  ;;  %s937_s18 = scalar_lea.hbm %s1336_s4, 256 }
 0x3cc   : > { %p934_p0 = scmp.ne.s32.totalorder %s1266_s19, %s933_s10  ;;  %p938_p3 = scmp.lt.s32.totalorder %s1266_s19, %s1336_s4 }
 0x3cd   : > { %p939_p6 = scmp.lt.s32.totalorder %s937_s18, %s933_s10 }
 0x3ce   : > { %p935_p5 = pnand %p934_p0, %p1351_p8 }
 0x3cf   : > { %p940_p11 = por %p939_p6, %p938_p3 }
 0x3d0   : > { %p936_p2 = pneg %p935_p5 }
 0x3d2   : > { %p941_p4 = pnand %p940_p11, %p936_p2 }
 0x3d4   : > { %944 = shalt.err (!%p941_p4)
}
 0x3d5   : > { %776 = dma.vmem_to_hbm [thread:$0]  (%p1351_p8), %s592_s17, 128, %s1266_s19, %s573_s24  }
 0x3d6   : > { %s243_s15 = scalar_lea.vmem [#allocation11], %s1217_s6  ;;  %s1295_s21 = scalar_lea.hbm %s1337_s5, %s747_s16 }
 0x3d7   : > { %s604_s13 = sshll.u32 %s243_s15, 4  ;;  %s578_s17 = scalar_lea.sflag [#allocation12], %s1214_s25  ;;  %s605_s13 = int_to_ptr.vmem [resolvable:$true] %s604_s13 }
 0x3d8   : > { %s945_s19 = scalar_lea.vmem %s605_s13, 128  ;;  %s1031_s6 = smov [#allocation11]  }
 0x3d9   : > { %p946_p12 = scmp.ne.s32.totalorder %s605_s13, %s945_s19  ;;  %s949_s24 = sshll.u32 %s1031_s6, 4  ;;  %s950_s24 = int_to_ptr.vmem [resolvable:$false] %s949_s24 }
 0x3da   : > { %s951_s23 = scalar_lea.vmem %s950_s24, 256  ;;  %p952_p7 = scmp.lt.s32.totalorder %s605_s13, %s950_s24 }
 0x3db   : > { %p947_p13 = pnand %p946_p12, %p1351_p8  ;;  %p953_p9 = scmp.lt.s32.totalorder %s951_s23, %s945_s19 }
 0x3dd   : > { %p948_p1 = pneg %p947_p13  ;;  %p954_p10 = por %p953_p9, %p952_p7 }
 0x3df   : > { %p955_p0 = pnand %p954_p10, %p948_p1 }
 0x411   : > { %v558_v44 = vpop.permute.xlu1 %557 }
 0x412   : > { %v568_v46 = vsel %vm248_vm1, %v1233_v1, %v558_v44 }
 0x415   : > { %v562_v45 = vpop.permute.xlu1 %561 }
 0x416   : > { %v569_v47 = vsel %vm549_vm5, %v568_v46, %v562_v45 }
 0x419   : > { %v566_v48 = vpop.permute.xlu1 %565 }
 0x41a   : > { %v570_v49 = vsel %vm551_vm6, %v569_v47, %v566_v48 }
 0x41b   : > { %571 = vst [vmem:[%s243_s15] sm:$0xff] %v570_v49 }
 0x41c   : > { %958 = shalt.err (!%p955_p0)
}
 0x41d   : > { %s959_s28 = scalar_lea.hbm %s1295_s21, 128  ;;  %s963_s10 = scalar_lea.hbm %s1337_s5, 256 }
 0x41e   : > { %p960_p5 = scmp.ne.s32.totalorder %s1295_s21, %s959_s28  ;;  %p964_p6 = scmp.lt.s32.totalorder %s1295_s21, %s1337_s5 }
 0x41f   : > { %p965_p11 = scmp.lt.s32.totalorder %s963_s10, %s959_s28 }
 0x420   : > { %p961_p2 = pnand %p960_p5, %p1351_p8 }
 0x421   : > { %p966_p4 = por %p965_p11, %p964_p6 }
 0x422   : > { %p962_p3 = pneg %p961_p2 }
 0x424   : > { %p967_p12 = pnand %p966_p4, %p962_p3 }
 0x426   : > { %970 = shalt.err (!%p967_p12)
}
 0x427   : > { %777 = dma.vmem_to_hbm [thread:$0]  (%p1351_p8), %s605_s13, 128, %s1295_s21, %s578_s17  }
 0x428 PF: > { %s616_s18 = sand.u32 1, %s1007_s0   ;;  %p1352_p13 = scmp.ne.s32.totalorder %s1344_s12, 0 }
 0x429   : > { %p1353_p1 = scmp.ge.s32.totalorder %s1019_s27, 2  ;;  %s617_s9 = scalar_lea.sflag [#allocation7], %s616_s18 }
 0x42b   : > { %p788_p7 = pnand %p1353_p1, %p1352_p13 }
 0x42d   : > { %p789_p9 = pneg %p788_p7 }
 0x42f   : > { %998 = dma.done.wait (%p789_p9), %s617_s9, 128  }
 0x430   : > { %1000 = vsyncadd (%p789_p9), %s617_s9, 4294967168  ;;  %s626_s14 = scalar_lea.sflag [#allocation12], %s616_s18 }
 0x431   : > { %1002 = dma.done.wait (%p789_p9), %s626_s14, 128  }
 0x432   : > { %1004 = vsyncadd (%p789_p9), %s626_s14, 4294967168  ;;  %p33_p8 = scmp.ge.s32.totalorder %s1093_s30, 4   ;;  %s1354_s0 = smov %s1011_s1 }
 0x433   : > { %s1355_s1 = smov %s1015_s26  ;;  %s1356_s26 = smov %s1105_s8 }
 0x434   : > { %s1357_s27 = smov %s1093_s30  ;;  %35 = sbr.rel (!%p33_p8) target bundleno = 25 (0x19), region = 103 }
 0x439   :  { %631 = vsyncpa [#allocation6], 1 }
 0x43a   :  { %633 = vsyncpa [#allocation6 + $0x1], 1 }
 0x43b   :  { %634 = vsyncpa [#allocation9], 1 }
 0x43c   :  { %636 = vsyncpa [#allocation9 + $0x1], 1 }
 0x43d   :  { %637 = vsyncpa [#allocation7], 1 }
 0x43e   :  { %639 = vsyncpa [#allocation7 + $0x1], 1 }
 0x43f   :  { %640 = vsyncpa [#allocation12], 1 }
 0x440   :  { %642 = vsyncpa [#allocation12 + $0x1], 1 }

</bundles_post_ra>
